<compile_context>
chip_gen: v7x
topology: tpu7x:2x2x1
jax: 0.10.0
libtpu: 0.0.40
codegen_flags: <defaults>
</compile_context>

<pallas_src>
import numpy as np
import jax
import jax.numpy as jnp
from jax import lax
from jax.experimental import pallas as pl
from jax.experimental.pallas import tpu as pltpu

_MAX_DMA_SLOTS = 16        # max concurrent HBM->HBM copies in flight (per core)
_NUM_CORE_SPLITS = 2       # leading "parallel" grid axis: shards DMA issue across the 2 TCs on v7x
_MAX_UNROLLED_RUNS = 64    # above this, switch to the O(1)-code dynamic gather kernel
_TARGET_DMA_BYTES = 2 << 20   # aim for ~2 MiB per copy
_MIN_SEGMENT_BYTES = 512      # never shrink a per-batch strided segment below this
_MIN_INFLIGHT_CHUNKS = 16     # try to have at least this many copies total
_MAX_TOTAL_CHUNKS = 64        # bound the unrolled start/wait instruction stream


def _coalesce_runs(sel):
    """Sorted selected channel ids -> list of (src_start, dst_start, length) runs."""
    runs = []
    run_start = int(sel[0])
    run_len = 1
    dst = 0
    for s in sel[1:]:
        s = int(s)
        if s == run_start + run_len:
            run_len += 1
        else:
            runs.append((run_start, dst, run_len))
            dst += run_len
            run_start = s
            run_len = 1
    runs.append((run_start, dst, run_len))
    return runs


def _chunk_runs(runs, n, hw, itemsize):
    """Split contiguous channel runs into DMA-sized chunks.

    Targets ~_TARGET_DMA_BYTES per copy, at least ~_MIN_INFLIGHT_CHUNKS copies
    total (keeps multiple DMA engines busy on v6e/v7x), at most roughly
    _MAX_TOTAL_CHUNKS copies (bounded unrolled code size), and never shrinks a
    per-batch strided segment below _MIN_SEGMENT_BYTES.
    """
    bytes_per_channel = n * hw * itemsize      # bytes one channel adds to a copy
    seg_bytes_per_channel = hw * itemsize      # per-batch strided segment size
    total_ch = sum(r[2] for r in runs)

    ch = max(1, _TARGET_DMA_BYTES // max(bytes_per_channel, 1))
    if total_ch // ch < _MIN_INFLIGHT_CHUNKS:                 # too few copies in flight
        ch = max(1, total_ch // _MIN_INFLIGHT_CHUNKS)
    ch = max(ch, -(-total_ch // _MAX_TOTAL_CHUNKS))            # cap total chunk count
    ch = max(ch, -(-_MIN_SEGMENT_BYTES // max(seg_bytes_per_channel, 1)))

    chunks = []
    for src, dst, ln in runs:
        off = 0
        while off < ln:
            step = min(ch, ln - off)
            chunks.append((src + off, dst + off, step))
            off += step
    return chunks


def _make_static_copy_kernel(partitions, num_slots):
    """Straight-line HBM->HBM DMA kernel.

    `partitions[k]` is the static list of (src_ch, dst_ch, n_ch) chunks issued
    by grid step / core k.  Up to `num_slots` copies are kept in flight per
    core.  A slot is reused only after waiting on the copy previously issued
    on it; the wait descriptor is rebuilt from the SAME chunk that was started
    on that slot, so the semaphore byte count matches even though chunk
    lengths differ.
    """

    def kernel(x_hbm, o_hbm, sems):
        core = pl.program_id(0)
        for core_id, chunks in enumerate(partitions):
            if not chunks:
                continue

            @pl.when(core == core_id)
            def _(chunks=chunks):
                def dma(i, slot):
                    src, dst, ln = chunks[i]
                    return pltpu.make_async_copy(
                        x_hbm.at[:, src:src + ln, :],
                        o_hbm.at[:, dst:dst + ln, :],
                        sems.at[slot],
                    )

                n = len(chunks)
                slots = min(num_slots, n)
                for i in range(n):
                    slot = i % slots
                    if i >= slots:
                        dma(i - slots, slot).wait()   # same chunk => same byte count
                    dma(i, slot).start()
                for i in range(max(n - slots, 0), n):
                    dma(i, i % slots).wait()

    return kernel


def _make_dynamic_gather_kernel(C, c_out, n_rows, depth):
    """O(1)-code-size fallback for masks with many runs.

    Input/output are viewed as (N*C, HW) / (N*c_out, HW).  The kernel loops
    over output rows, reads the source channel id from the SMEM-prefetched
    `sel` table and issues one HBM->HBM row copy per iteration, keeping
    `depth` copies in flight.  All copies move the same number of bytes, so
    rebuilding the wait descriptor with a constant row index is safe.
    """

    def kernel(sel_ref, x_hbm, o_hbm, sems):
        def drain(slot):
            pltpu.make_async_copy(x_hbm.at[0], o_hbm.at[0], sems.at[slot]).wait()

        @pl.loop(0, n_rows)
        def _(i):
            slot = i % depth

            @pl.when(i >= depth)
            def _():
                drain(slot)               # frees the copy issued `depth` iters ago

            n = i // c_out
            j = i - n * c_out
            src_row = n * C + sel_ref[j]
            pltpu.make_async_copy(
                x_hbm.at[src_row], o_hbm.at[i], sems.at[slot]
            ).start()

        # The last min(depth, n_rows) iterations are still outstanding.
        for t in range(min(depth, n_rows)):
            drain((max(n_rows - depth, 0) + t) % depth)

    return kernel


def channel_selection_forward(x, indices_bool):
    """
    x:            (N, C, H, W) array (output of a BatchNorm2d layer).
    indices_bool: length-C boolean mask (the `indices` buffer).  Must be a
                  *concrete* host value (numpy array / list / concrete jax
                  array): it is resolved at trace time, so each distinct mask
                  retraces once.  Passing a traced value raises.
    Returns x[:, indices_bool] with shape (N, C_out, H, W).
    """
    indices_bool = np.asarray(indices_bool).astype(bool)  # raises on tracers (intended)
    N, C, H, W = x.shape
    assert indices_bool.shape == (C,), (indices_bool.shape, C)

    sel = np.nonzero(indices_bool)[0]
    c_out = int(sel.shape[0])

    # Trivial masks: never launch a kernel.
    if c_out == 0:
        return jnp.zeros((N, 0, H, W), dtype=x.dtype)
    if c_out == C:
        return x                      # identity selection (the default all-ones buffer)

    runs = _coalesce_runs(sel)

    # One contiguous run is just a slice: let XLA handle it so it can fuse into
    # the consumer and avoid materializing the copy at all.
    if len(runs) == 1:
        start, _, length = runs[0]
        return lax.slice_in_dim(x, start, start + length, axis=1)

    HW = H * W
    itemsize = int(np.dtype(x.dtype).itemsize)
    # Pure copy: tell XLA's scheduler how many HBM bytes this custom call moves.
    cost = pl.CostEstimate(flops=0, transcendentals=0,
                           bytes_accessed=2 * N * c_out * HW * itemsize)

    if len(runs) > _MAX_UNROLLED_RUNS:
        # Many tiny runs (e.g. alternating prune on a wide layer): a fully
        # unrolled DMA list would blow up code size / compile time and saturate
        # the scalar issue slot, so use the dynamic SMEM-table gather instead.
        n_rows = N * c_out
        depth = min(_MAX_DMA_SLOTS, n_rows)
        out2 = pl.pallas_call(
            _make_dynamic_gather_kernel(C, c_out, n_rows, depth),
            out_shape=jax.ShapeDtypeStruct((n_rows, HW), x.dtype),
            grid_spec=pltpu.PrefetchScalarGridSpec(
                num_scalar_prefetch=1,
                grid=(1,),
                in_specs=[pl.BlockSpec(memory_space=pl.ANY)],
                out_specs=pl.BlockSpec(memory_space=pl.ANY),
                scratch_shapes=[pltpu.SemaphoreType.DMA((depth,))],
            ),
            cost_estimate=cost,
        )(jnp.asarray(sel, dtype=jnp.int32), x.reshape(N * C, HW))
        return out2.reshape(N, c_out, H, W)

    # Main path: coalesced runs split into DMA-sized chunks, issued as direct
    # HBM->HBM strided copies.  The chunk list is round-robined over a size-2
    # "parallel" grid axis so both TensorCores issue copies on v7x; on v5e/v6e
    # (one core) the two grid steps just run back-to-back.
    chunks = _chunk_runs(runs, N, HW, itemsize)
    partitions = tuple(tuple(chunks[k::_NUM_CORE_SPLITS])
                       for k in range(_NUM_CORE_SPLITS))
    num_slots = min(_MAX_DMA_SLOTS, max(len(p) for p in partitions))

    x3 = x.reshape(N, C, HW)   # free, contiguous view: each chunk is N strided segments
    out3 = pl.pallas_call(
        _make_static_copy_kernel(partitions, num_slots),
        out_shape=jax.ShapeDtypeStruct((N, c_out, HW), x.dtype),
        grid=(_NUM_CORE_SPLITS,),
        in_specs=[pl.BlockSpec(memory_space=pl.ANY)],
        out_specs=pl.BlockSpec(memory_space=pl.ANY),
        scratch_shapes=[pltpu.SemaphoreType.DMA((num_slots,))],
        compiler_params=pltpu.CompilerParams(dimension_semantics=("parallel",)),
        cost_estimate=cost,
    )(x3)
    return out3.reshape(N, c_out, H, W)


class ChannelSelection:
    """JAX counterpart of the PyTorch `channel_selection` module."""

    def __init__(self, num_channels):
        # deterministic init: all-ones boolean buffer (same as the PyTorch module)
        self.indices = np.ones((num_channels,), dtype=bool)

    def __call__(self, input_tensor):
        return channel_selection_forward(input_tensor, self.indices)


if __name__ == "__main__":
    key = jax.random.PRNGKey(0)
    k1, k2, k3, k4 = jax.random.split(key, 4)

    # Case 1: prune one channel -> two contiguous runs -> chunked HBM->HBM DMAs.
    N, C, H, W = 2, 4, 16, 16
    x = jax.random.normal(k1, (N, C, H, W), dtype=jnp.float32)
    mod = ChannelSelection(C)
    mod.indices[1] = False
    out = jax.block_until_ready(mod(x))
    ref = np.asarray(x)[:, mod.indices]
    assert out.shape == ref.shape, (out.shape, ref.shape)
    np.testing.assert_array_equal(np.asarray(out), ref)

    # Case 2: identity (all-ones) mask -> short-circuit, no kernel launch.
    mod_full = ChannelSelection(C)
    out_full = jax.block_until_ready(mod_full(x))
    np.testing.assert_array_equal(np.asarray(out_full), np.asarray(x))

    # Case 3: alternating mask with more runs (10) than slots used per core
    # -> exercises chunking, the 2-step "parallel" grid and in-flight slot reuse.
    N2, C2, H2, W2 = 2, 20, 8, 16
    x2 = jax.random.normal(k2, (N2, C2, H2, W2), dtype=jnp.float32)
    mod_alt = ChannelSelection(C2)
    mod_alt.indices[:] = (np.arange(C2) % 2) == 0
    out_alt = jax.block_until_ready(mod_alt(x2))
    ref_alt = np.asarray(x2)[:, mod_alt.indices]
    assert out_alt.shape == ref_alt.shape, (out_alt.shape, ref_alt.shape)
    np.testing.assert_array_equal(np.asarray(out_alt), ref_alt)

    # Case 4: all channels pruned -> empty output, no kernel launch.
    mod_empty = ChannelSelection(C)
    mod_empty.indices[:] = False
    out_empty = jax.block_until_ready(mod_empty(x))
    assert out_empty.shape == (N, 0, H, W), out_empty.shape

    # Case 5: one contiguous pruned block -> single run -> lax.slice short-circuit.
    N5, C5, H5, W5 = 2, 8, 8, 16
    x5 = jax.random.normal(k3, (N5, C5, H5, W5), dtype=jnp.float32)
    mod_slice = ChannelSelection(C5)
    mod_slice.indices[5:] = False
    out_slice = jax.block_until_ready(mod_slice(x5))
    ref_slice = np.asarray(x5)[:, mod_slice.indices]
    np.testing.assert_array_equal(np.asarray(out_slice), ref_slice)

    # Case 6: wide alternating mask (80 runs > 64) -> dynamic SMEM-table gather
    # fallback with pipelined per-row DMAs.
    N6, C6, H6, W6 = 2, 160, 8, 16
    x6 = jax.random.normal(k4, (N6, C6, H6, W6), dtype=jnp.float32)
    mod_many = ChannelSelection(C6)
    mod_many.indices[:] = (np.arange(C6) % 2) == 0
    out_many = jax.block_until_ready(mod_many(x6))
    ref_many = np.asarray(x6)[:, mod_many.indices]
    assert out_many.shape == ref_many.shape, (out_many.shape, ref_many.shape)
    np.testing.assert_array_equal(np.asarray(out_many), ref_many)

    print("KERNEL_OK")
</pallas_src>

<mosaic_0001>
module attributes {stable_mosaic.version = 11 : i64} {
  func.func @kernel(%arg0: i32, %arg1: memref<2x4x256xf32, #tpu.memory_space<any>>, %arg2: memref<2x3x256xf32, #tpu.memory_space<any>>, %arg3: memref<2x!tpu.dma_semaphore, #tpu.memory_space<semaphore_mem>>) attributes {dimension_semantics = [#tpu.dimension_semantics<parallel>], iteration_bounds = array<i64: 2>, scalar_prefetch = 0 : i64, scratch_operands = 1 : i64, tpu.core_type = #tpu.core_type<tc>, window_params = [{}, {}]} {
    %c0_i32 = arith.constant 0 : i32
    %0 = arith.cmpi eq, %arg0, %c0_i32 : i32
    %1 = arith.extui %0 : i1 to i32
    %c0_i32_0 = arith.constant 0 : i32
    %2 = arith.cmpi ne, %1, %c0_i32_0 : i32
    scf.if %2 {
      %c0_i32_2 = arith.constant 0 : i32
      %c0_i32_3 = arith.constant 0 : i32
      %c0_i32_4 = arith.constant 0 : i32
      %c0_i32_5 = arith.constant 0 : i32
      %6 = tpu.memref_slice %arg1[%c0_i32_3, %c0_i32_4, %c0_i32_5] : memref<2x4x256xf32, #tpu.memory_space<any>> -> memref<2x1x256xf32, #tpu.memory_space<any>>
      %c0_i32_6 = arith.constant 0 : i32
      %c0_i32_7 = arith.constant 0 : i32
      %c0_i32_8 = arith.constant 0 : i32
      %7 = tpu.memref_slice %arg2[%c0_i32_6, %c0_i32_7, %c0_i32_8] : memref<2x3x256xf32, #tpu.memory_space<any>> -> memref<2x1x256xf32, #tpu.memory_space<any>>
      %8 = tpu.memref_slice %arg3[%c0_i32_2] : memref<2x!tpu.dma_semaphore, #tpu.memory_space<semaphore_mem>> -> memref<1x!tpu.dma_semaphore, #tpu.memory_space<semaphore_mem>>
      %9 = tpu.memref_squeeze %8 : memref<1x!tpu.dma_semaphore, #tpu.memory_space<semaphore_mem>> -> memref<!tpu.dma_semaphore, #tpu.memory_space<semaphore_mem>>
      tpu.enqueue_dma source(%6 : memref<2x1x256xf32, #tpu.memory_space<any>>) target(%7 : memref<2x1x256xf32, #tpu.memory_space<any>>) target_semaphore(%9 : memref<!tpu.dma_semaphore, #tpu.memory_space<semaphore_mem>>)
      %c1_i32_9 = arith.constant 1 : i32
      %c0_i32_10 = arith.constant 0 : i32
      %c3_i32 = arith.constant 3 : i32
      %c0_i32_11 = arith.constant 0 : i32
      %10 = tpu.memref_slice %arg1[%c0_i32_10, %c3_i32, %c0_i32_11] : memref<2x4x256xf32, #tpu.memory_space<any>> -> memref<2x1x256xf32, #tpu.memory_space<any>>
      %c0_i32_12 = arith.constant 0 : i32
      %c2_i32 = arith.constant 2 : i32
      %c0_i32_13 = arith.constant 0 : i32
      %11 = tpu.memref_slice %arg2[%c0_i32_12, %c2_i32, %c0_i32_13] : memref<2x3x256xf32, #tpu.memory_space<any>> -> memref<2x1x256xf32, #tpu.memory_space<any>>
      %12 = tpu.memref_slice %arg3[%c1_i32_9] : memref<2x!tpu.dma_semaphore, #tpu.memory_space<semaphore_mem>> -> memref<1x!tpu.dma_semaphore, #tpu.memory_space<semaphore_mem>>
      %13 = tpu.memref_squeeze %12 : memref<1x!tpu.dma_semaphore, #tpu.memory_space<semaphore_mem>> -> memref<!tpu.dma_semaphore, #tpu.memory_space<semaphore_mem>>
      tpu.enqueue_dma source(%10 : memref<2x1x256xf32, #tpu.memory_space<any>>) target(%11 : memref<2x1x256xf32, #tpu.memory_space<any>>) target_semaphore(%13 : memref<!tpu.dma_semaphore, #tpu.memory_space<semaphore_mem>>)
      %c0_i32_14 = arith.constant 0 : i32
      %c0_i32_15 = arith.constant 0 : i32
      %c0_i32_16 = arith.constant 0 : i32
      %c0_i32_17 = arith.constant 0 : i32
      %14 = tpu.memref_slice %arg1[%c0_i32_15, %c0_i32_16, %c0_i32_17] : memref<2x4x256xf32, #tpu.memory_space<any>> -> memref<2x1x256xf32, #tpu.memory_space<any>>
      %c0_i32_18 = arith.constant 0 : i32
      %c0_i32_19 = arith.constant 0 : i32
      %c0_i32_20 = arith.constant 0 : i32
      %15 = tpu.memref_slice %arg2[%c0_i32_18, %c0_i32_19, %c0_i32_20] : memref<2x3x256xf32, #tpu.memory_space<any>> -> memref<2x1x256xf32, #tpu.memory_space<any>>
      %16 = tpu.memref_slice %arg3[%c0_i32_14] : memref<2x!tpu.dma_semaphore, #tpu.memory_space<semaphore_mem>> -> memref<1x!tpu.dma_semaphore, #tpu.memory_space<semaphore_mem>>
      %17 = tpu.memref_squeeze %16 : memref<1x!tpu.dma_semaphore, #tpu.memory_space<semaphore_mem>> -> memref<!tpu.dma_semaphore, #tpu.memory_space<semaphore_mem>>
      tpu.wait_dma2 semaphore(%17 : memref<!tpu.dma_semaphore, #tpu.memory_space<semaphore_mem>>) src(%14 : memref<2x1x256xf32, #tpu.memory_space<any>>) dst(%15 : memref<2x1x256xf32, #tpu.memory_space<any>>)
      %c1_i32_21 = arith.constant 1 : i32
      %c0_i32_22 = arith.constant 0 : i32
      %c3_i32_23 = arith.constant 3 : i32
      %c0_i32_24 = arith.constant 0 : i32
      %18 = tpu.memref_slice %arg1[%c0_i32_22, %c3_i32_23, %c0_i32_24] : memref<2x4x256xf32, #tpu.memory_space<any>> -> memref<2x1x256xf32, #tpu.memory_space<any>>
      %c0_i32_25 = arith.constant 0 : i32
      %c2_i32_26 = arith.constant 2 : i32
      %c0_i32_27 = arith.constant 0 : i32
      %19 = tpu.memref_slice %arg2[%c0_i32_25, %c2_i32_26, %c0_i32_27] : memref<2x3x256xf32, #tpu.memory_space<any>> -> memref<2x1x256xf32, #tpu.memory_space<any>>
      %20 = tpu.memref_slice %arg3[%c1_i32_21] : memref<2x!tpu.dma_semaphore, #tpu.memory_space<semaphore_mem>> -> memref<1x!tpu.dma_semaphore, #tpu.memory_space<semaphore_mem>>
      %21 = tpu.memref_squeeze %20 : memref<1x!tpu.dma_semaphore, #tpu.memory_space<semaphore_mem>> -> memref<!tpu.dma_semaphore, #tpu.memory_space<semaphore_mem>>
      tpu.wait_dma2 semaphore(%21 : memref<!tpu.dma_semaphore, #tpu.memory_space<semaphore_mem>>) src(%18 : memref<2x1x256xf32, #tpu.memory_space<any>>) dst(%19 : memref<2x1x256xf32, #tpu.memory_space<any>>)
    } else {
    }
    %c1_i32 = arith.constant 1 : i32
    %3 = arith.cmpi eq, %arg0, %c1_i32 : i32
    %4 = arith.extui %3 : i1 to i32
    %c0_i32_1 = arith.constant 0 : i32
    %5 = arith.cmpi ne, %4, %c0_i32_1 : i32
    scf.if %5 {
      %c0_i32_2 = arith.constant 0 : i32
      %c0_i32_3 = arith.constant 0 : i32
      %c2_i32 = arith.constant 2 : i32
      %c0_i32_4 = arith.constant 0 : i32
      %6 = tpu.memref_slice %arg1[%c0_i32_3, %c2_i32, %c0_i32_4] : memref<2x4x256xf32, #tpu.memory_space<any>> -> memref<2x1x256xf32, #tpu.memory_space<any>>
      %c0_i32_5 = arith.constant 0 : i32
      %c1_i32_6 = arith.constant 1 : i32
      %c0_i32_7 = arith.constant 0 : i32
      %7 = tpu.memref_slice %arg2[%c0_i32_5, %c1_i32_6, %c0_i32_7] : memref<2x3x256xf32, #tpu.memory_space<any>> -> memref<2x1x256xf32, #tpu.memory_space<any>>
      %8 = tpu.memref_slice %arg3[%c0_i32_2] : memref<2x!tpu.dma_semaphore, #tpu.memory_space<semaphore_mem>> -> memref<1x!tpu.dma_semaphore, #tpu.memory_space<semaphore_mem>>
      %9 = tpu.memref_squeeze %8 : memref<1x!tpu.dma_semaphore, #tpu.memory_space<semaphore_mem>> -> memref<!tpu.dma_semaphore, #tpu.memory_space<semaphore_mem>>
      tpu.enqueue_dma source(%6 : memref<2x1x256xf32, #tpu.memory_space<any>>) target(%7 : memref<2x1x256xf32, #tpu.memory_space<any>>) target_semaphore(%9 : memref<!tpu.dma_semaphore, #tpu.memory_space<semaphore_mem>>)
      %c0_i32_8 = arith.constant 0 : i32
      %c0_i32_9 = arith.constant 0 : i32
      %c2_i32_10 = arith.constant 2 : i32
      %c0_i32_11 = arith.constant 0 : i32
      %10 = tpu.memref_slice %arg1[%c0_i32_9, %c2_i32_10, %c0_i32_11] : memref<2x4x256xf32, #tpu.memory_space<any>> -> memref<2x1x256xf32, #tpu.memory_space<any>>
      %c0_i32_12 = arith.constant 0 : i32
      %c1_i32_13 = arith.constant 1 : i32
      %c0_i32_14 = arith.constant 0 : i32
      %11 = tpu.memref_slice %arg2[%c0_i32_12, %c1_i32_13, %c0_i32_14] : memref<2x3x256xf32, #tpu.memory_space<any>> -> memref<2x1x256xf32, #tpu.memory_space<any>>
      %12 = tpu.memref_slice %arg3[%c0_i32_8] : memref<2x!tpu.dma_semaphore, #tpu.memory_space<semaphore_mem>> -> memref<1x!tpu.dma_semaphore, #tpu.memory_space<semaphore_mem>>
      %13 = tpu.memref_squeeze %12 : memref<1x!tpu.dma_semaphore, #tpu.memory_space<semaphore_mem>> -> memref<!tpu.dma_semaphore, #tpu.memory_space<semaphore_mem>>
      tpu.wait_dma2 semaphore(%13 : memref<!tpu.dma_semaphore, #tpu.memory_space<semaphore_mem>>) src(%10 : memref<2x1x256xf32, #tpu.memory_space<any>>) dst(%11 : memref<2x1x256xf32, #tpu.memory_space<any>>)
    } else {
    }
    return
  }
}

</mosaic_0001>

<bundles_post_ra>
// kernel: tpu_custom_call.1
= control target key start
LH: loop header
LB: loop body
LE: loop exit
PB: predicated region body
PF: predicated region fallthrough
CT: control target
= control target key end

     0   :  { %s209_s6 = smov 0   ;;  %s320_s0 = inlined_call_operand.hbm [shape: f32[2,4,256], index: 0, kind: input, shape index: {}]   ;;  %s321_s1 = inlined_call_operand.vmem [shape: f32[2,3,256], index: 1, kind: output, shape index: {}]  }
   0x1 LB: > { %s18_s9 = sshll.u32 %s321_s1, 4  ;;  %p81_p0 = scmp.eq.s32.totalorder %s195_s6, 0  ;;  %s195_s6 = sphi %s209_s6, %s11_s6   ;;  %s217_s9 = int_to_ptr.vmem [resolvable:$true] %s18_s9 }
   0x2   : > { %s93_s12 = scalar_lea.hbm %s320_s0, 64  ;;  %s231_s17 = scalar_lea.hbm %s320_s0, 256 }
   0x3   : > { %p94_p1 = scmp.ne.s32.totalorder %s320_s0, %s93_s12  ;;  %p98_p4 = scmp.lt.u32.totalorder %s231_s17, %s93_s12 }
   0x4   : > { %p99_p5 = scmp.lt.u32.totalorder %s93_s12, %s320_s0 }
   0x5   : > { %p95_p2 = pnand %p94_p1, %p81_p0 }
   0x6   : > { %p100_p6 = por %p99_p5, %p98_p4 }
   0x7   : > { %p96_p3 = pneg %p95_p2 }
   0x9   : > { %p101_p7 = pnand %p100_p6, %p96_p3 }
   0xb   : > { %104 = shalt.err (!%p101_p7)  }
   0xc   : > { %s105_s20 = scalar_lea.vmem %s217_s9, 64  ;;  %s242_s21 = scalar_lea.vmem %s217_s9, 256 }
   0xd   : > { %p106_p8 = scmp.ne.s32.totalorder %s217_s9, %s105_s20  ;;  %p112_p11 = scmp.lt.s32.totalorder %s217_s9, %s217_s9 }
   0xe   : > { %p113_p12 = scmp.lt.s32.totalorder %s242_s21, %s105_s20 }
   0xf   : > { %p107_p9 = pnand %p106_p8, %p81_p0 }
  0x10   : > { %p114_p13 = por %p113_p12, %p112_p11 }
  0x11   : > { %p108_p10 = pneg %p107_p9 }
  0x13   : > { %p115_p1 = pnand %p114_p13, %p108_p10 }
  0x15   : > { %118 = shalt.err (!%p115_p1)  }
  0x16   : > { %s197_s22 = smov 64   ;;  %s198_s23 = smov 1  }
  0x17   : > { %74 = dma.hbm_to_vmem [thread:$0]  (%p81_p0), %s320_s0, 64, %s217_s9, [#allocation2], %s197_s22, %s197_s22, %s198_s23 }
  0x18   : > { %s22_s28 = scalar_lea.hbm %s320_s0, 48  ;;  %s23_s2 = scalar_lea.vmem %s321_s1, 2 }
  0x19   : > { %s26_s3 = sshll.u32 %s23_s2, 4  ;;  %s147_s7 = scalar_lea.hbm %s320_s0, 112  ;;  %s27_s3 = int_to_ptr.vmem [resolvable:$true] %s26_s3 }
  0x1a   : > { %p120_p2 = scmp.ne.s32.totalorder %s22_s28, %s147_s7  ;;  %p124_p5 = scmp.lt.u32.totalorder %s22_s28, %s320_s0 }
  0x1b   : > { %p125_p6 = scmp.lt.u32.totalorder %s231_s17, %s147_s7  ;;  %p127_p8 = scmp.lt.u32.totalorder %s147_s7, %s22_s28 }
  0x1c   : > { %p121_p3 = pnand %p120_p2, %p81_p0 }
  0x1d   : > { %p126_p7 = por %p125_p6, %p124_p5 }
  0x1e   : > { %p122_p4 = pneg %p121_p3 }
  0x1f   : > { %p128_p9 = por %p127_p8, %p126_p7 }
  0x21   : > { %p129_p10 = pnand %p128_p9, %p122_p4 }
  0x23   : > { %132 = shalt.err (!%p129_p10)  }
  0x24   : > { %s133_s11 = scalar_lea.vmem %s27_s3, 64  ;;  %p140_p1 = scmp.lt.s32.totalorder %s27_s3, %s217_s9 }
  0x25   : > { %p134_p11 = scmp.ne.s32.totalorder %s27_s3, %s133_s11  ;;  %p141_p2 = scmp.lt.s32.totalorder %s242_s21, %s133_s11 }
  0x27   : > { %p135_p12 = pnand %p134_p11, %p81_p0  ;;  %p142_p3 = por %p141_p2, %p140_p1 }
  0x29   : > { %p136_p13 = pneg %p135_p12 }
  0x2b   : > { %p143_p5 = pnand %p142_p3, %p136_p13 }
  0x2d   : > { %146 = shalt.err (!%p143_p5)  }
  0x2e   : > { %75 = dma.hbm_to_vmem [thread:$0]  (%p81_p0), %s22_s28, 64, %s27_s3, [#allocation2 + $0x1], %s197_s22, %s197_s22, %s198_s23 }
  0x2f   : > { %182 = dma.done.wait (%p81_p0), [#allocation2], 64 }
  0x30   : > { %184 = vsyncadd (%p81_p0), [#allocation2], 4294967232 }
  0x31   : > { %186 = dma.done.wait (%p81_p0), [#allocation2 + $0x1], 64 }
  0x32   : > { %188 = vsyncadd (%p81_p0), [#allocation2 + $0x1], 4294967232  ;;  %p82_p4 = scmp.eq.s32.totalorder %s195_s6, 1  ;;  %s40_s14 = scalar_lea.hbm %s320_s0, 32 }
  0x33   : > { %s41_s18 = scalar_lea.vmem %s321_s1, 1  ;;  %s176_s25 = scalar_lea.hbm %s320_s0, 96 }
  0x34   : > { %s43_s19 = sshll.u32 %s41_s18, 4  ;;  %p149_p6 = scmp.ne.s32.totalorder %s40_s14, %s176_s25  ;;  %s44_s19 = int_to_ptr.vmem [resolvable:$true] %s43_s19 }
  0x35   : > { %p153_p8 = scmp.lt.u32.totalorder %s40_s14, %s320_s0  ;;  %p154_p9 = scmp.lt.u32.totalorder %s231_s17, %s176_s25 }
  0x36   : > { %p150_p0 = pnand %p149_p6, %p82_p4  ;;  %p156_p11 = scmp.lt.u32.totalorder %s176_s25, %s40_s14 }
  0x37   : > { %p155_p10 = por %p154_p9, %p153_p8 }
  0x38   : > { %p151_p7 = pneg %p150_p0 }
  0x39   : > { %p157_p12 = por %p156_p11, %p155_p10 }
  0x3b   : > { %p158_p13 = pnand %p157_p12, %p151_p7 }
  0x3d   : > { %161 = shalt.err (!%p158_p13)  }
  0x3e   : > { %s162_s28 = scalar_lea.vmem %s44_s19, 64  ;;  %p169_p5 = scmp.lt.s32.totalorder %s44_s19, %s217_s9 }
  0x3f   : > { %p163_p1 = scmp.ne.s32.totalorder %s44_s19, %s162_s28  ;;  %p170_p6 = scmp.lt.s32.totalorder %s242_s21, %s162_s28 }
  0x41   : > { %p164_p2 = pnand %p163_p1, %p82_p4  ;;  %p171_p0 = por %p170_p6, %p169_p5 }
  0x43   : > { %p165_p3 = pneg %p164_p2 }
  0x45   : > { %p172_p8 = pnand %p171_p0, %p165_p3 }
  0x47   : > { %175 = shalt.err (!%p172_p8)  }
  0x48   : > { %79 = dma.hbm_to_vmem [thread:$0]  (%p82_p4), %s40_s14, 64, %s44_s19, [#allocation2], %s197_s22, %s197_s22, %s198_s23 }
  0x49   : > { %190 = dma.done.wait (%p82_p4), [#allocation2], 64 }
  0x4a   : > { %192 = vsyncadd (%p82_p4), [#allocation2], 4294967232  ;;  %s11_s6 = sadd.s32 1, %s195_s6  }
  0x4b   : > { %p8_p7 = scmp.ge.s32.totalorder %s11_s6, 2  }
  0x4d   :  { %10 = sbr.rel (!%p8_p7) target bundleno = 1 (0x1), region = 33 }
  0x54   :  { %51 = vsyncmov [#allocation2] }
  0x57   :  { %s52_s9 = vpop.sfrf %51 }
  0x58   :  { %p71_p9 = scmp.ne.s32.totalorder %s52_s9, 0 }
  0x5a   :  { %56 = shalt.err (%p71_p9)  }
  0x5b   :  { %58 = vsyncmov [#allocation2 + $0x1] }
  0x5e   :  { %s59_s17 = vpop.sfrf %58 }
  0x5f   :  { %p72_p10 = scmp.ne.s32.totalorder %s59_s17, 0 }
  0x61   :  { %63 = shalt.err (%p72_p10)  }

</bundles_post_ra>
